<compile_context>
chip_gen: v6e
topology: v6e:2x2x1
jax: 0.10.0
libtpu: 0.0.40
codegen_flags: <defaults>
</compile_context>

<pallas_src>
import functools

import jax
import jax.numpy as jnp
from jax.experimental import pallas as pl
from jax.experimental.pallas import tpu as pltpu


# ----------------------------------------------------------------------------
# Fused Pallas kernel: whole Autoencoder.forward in one launch
# ----------------------------------------------------------------------------
def _fused_autoencoder_kernel(
    # ---- inputs -------------------------------------------------------------
    x_ref,
    e0w_ref, e0b_ref, e1w_ref, e1b_ref, e2w_ref, e2b_ref,            # encoder
    p0w_ref, p0b_ref, p1w_ref, p1b_ref, p2w_ref, p2b_ref,            # predictor
    d0wz_ref, d0wy_ref, d0b_ref, d1w_ref, d1b_ref, d2w_ref, d2b_ref,  # decoder
    r0w_ref, r1w_ref,                                                 # reg weights
    # ---- outputs ------------------------------------------------------------
    x_pred_ref, y_pred_ref, reg_ref,
    *, l2_reg,
):
    def dense(h, w_ref, b_ref, relu):
        acc = jnp.dot(h, w_ref[...], preferred_element_type=jnp.float32)
        acc = acc + b_ref[...]            # (1, N) bias broadcasts over batch rows
        return jnp.maximum(acc, 0.0) if relu else acc

    x = x_ref[...].astype(jnp.float32)

    # encoder: Linear+ReLU, Linear+ReLU, Linear, Dropout (identity in eval)
    h = dense(x, e0w_ref, e0b_ref, relu=True)
    h = dense(h, e1w_ref, e1b_ref, relu=True)
    z = dense(h, e2w_ref, e2b_ref, relu=False)

    # predictor: Linear+ReLU, Linear+ReLU, Linear, Dropout (identity)
    h = dense(z, p0w_ref, p0b_ref, relu=True)
    h = dense(h, p1w_ref, p1b_ref, relu=True)
    y_pred = dense(h, p2w_ref, p2b_ref, relu=False)

    # decoder on concat([z, y_pred], dim=1) -- concat removed via weight split
    h = jnp.dot(z, d0wz_ref[...], preferred_element_type=jnp.float32)
    h = h + jnp.dot(y_pred, d0wy_ref[...], preferred_element_type=jnp.float32)
    h = jnp.maximum(h + d0b_ref[...], 0.0)
    h = dense(h, d1w_ref, d1b_ref, relu=True)
    x_pred = dense(h, d2w_ref, d2b_ref, relu=False)

    x_pred_ref[...] = x_pred.astype(x_pred_ref.dtype)
    y_pred_ref[...] = y_pred.astype(y_pred_ref.dtype)

    # reg_loss = l2_reg * (||W_reg0||_F + ||W_reg1||_F)
    w0 = r0w_ref[...].astype(jnp.float32)
    w1 = r1w_ref[...].astype(jnp.float32)
    reg = jnp.sqrt(jnp.sum(w0 * w0)) + jnp.sqrt(jnp.sum(w1 * w1))
    reg_ref[0, 0] = reg * l2_reg


def _full_vmem_spec(shape):
    n = len(shape)
    return pl.BlockSpec(shape, lambda: (0,) * n)


def autoencoder_forward(params, x, l2_reg):
    """Single fused pallas_call for the whole forward pass."""
    B = x.shape[0]
    input_dim = params["dec2"][0].shape[1]
    output_dim = params["pred2"][0].shape[1]
    assert x.shape[1] == params["enc0"][0].shape[0]

    inputs = (
        x,
        params["enc0"][0], params["enc0"][1],
        params["enc1"][0], params["enc1"][1],
        params["enc2"][0], params["enc2"][1],
        params["pred0"][0], params["pred0"][1],
        params["pred1"][0], params["pred1"][1],
        params["pred2"][0], params["pred2"][1],
        params["dec0_wz"], params["dec0_wy"], params["dec0_b"],
        params["dec1"][0], params["dec1"][1],
        params["dec2"][0], params["dec2"][1],
        params["reg0_w"], params["reg1_w"],
    )

    kernel = functools.partial(_fused_autoencoder_kernel, l2_reg=float(l2_reg))
    x_pred, y_pred, reg = pl.pallas_call(
        kernel,
        out_shape=(
            jax.ShapeDtypeStruct((B, input_dim), x.dtype),
            jax.ShapeDtypeStruct((B, output_dim), x.dtype),
            jax.ShapeDtypeStruct((1, 1), jnp.float32),
        ),
        in_specs=[_full_vmem_spec(a.shape) for a in inputs],
        out_specs=(
            _full_vmem_spec((B, input_dim)),
            _full_vmem_spec((B, output_dim)),
            pl.BlockSpec(memory_space=pltpu.MemorySpace.SMEM),
        ),
    )(*inputs)
    return x_pred, y_pred, reg[0, 0]


# ----------------------------------------------------------------------------
# Parameter construction (deterministic, PyTorch-default-style uniform init)
# ----------------------------------------------------------------------------
def _init_linear(key, fan_in, fan_out):
    kw, kb = jax.random.split(key)
    bound = 1.0 / (float(fan_in) ** 0.5)
    # stored as (in, out) so the kernel does x @ W; bias stored 2-D (1, out)
    w = jax.random.uniform(kw, (fan_in, fan_out), jnp.float32, -bound, bound)
    b = jax.random.uniform(kb, (1, fan_out), jnp.float32, -bound, bound)
    return w, b


def make_params(key, input_dim, hidden_dim, latent_dim, output_dim):
    keys = jax.random.split(key, 11)
    p = {}
    # encoder
    p["enc0"] = _init_linear(keys[0], input_dim, hidden_dim)
    p["enc1"] = _init_linear(keys[1], hidden_dim, hidden_dim)
    p["enc2"] = _init_linear(keys[2], hidden_dim, latent_dim)
    # predictor
    p["pred0"] = _init_linear(keys[3], latent_dim, hidden_dim)
    p["pred1"] = _init_linear(keys[4], hidden_dim, hidden_dim)
    p["pred2"] = _init_linear(keys[5], hidden_dim, output_dim)
    # decoder (first layer pre-split so the concat never materializes)
    dec0_w, dec0_b = _init_linear(keys[6], latent_dim + output_dim, hidden_dim)
    p["dec0_wz"] = dec0_w[:latent_dim]      # rows multiplying z
    p["dec0_wy"] = dec0_w[latent_dim:]      # rows multiplying y_pred
    p["dec0_b"] = dec0_b
    p["dec1"] = _init_linear(keys[7], hidden_dim, hidden_dim)
    p["dec2"] = _init_linear(keys[8], hidden_dim, input_dim)
    # regularization layers (only weights enter the forward pass)
    p["reg0_w"] = _init_linear(keys[9], hidden_dim, hidden_dim)[0]
    p["reg1_w"] = _init_linear(keys[10], latent_dim, latent_dim)[0]
    return p


# ----------------------------------------------------------------------------
# Pure-JAX reference (for a sanity check only)
# ----------------------------------------------------------------------------
def reference_forward(params, x, l2_reg):
    hi = jax.lax.Precision.HIGHEST

    def lin(h, w, b, relu):
        y = jnp.dot(h, w, precision=hi) + b
        return jnp.maximum(y, 0.0) if relu else y

    h = lin(x, params["enc0"][0], params["enc0"][1], True)
    h = lin(h, params["enc1"][0], params["enc1"][1], True)
    z = lin(h, params["enc2"][0], params["enc2"][1], False)

    h = lin(z, params["pred0"][0], params["pred0"][1], True)
    h = lin(h, params["pred1"][0], params["pred1"][1], True)
    y_pred = lin(h, params["pred2"][0], params["pred2"][1], False)

    concat = jnp.concatenate([z, y_pred], axis=1)
    dec0_w = jnp.concatenate([params["dec0_wz"], params["dec0_wy"]], axis=0)
    h = lin(concat, dec0_w, params["dec0_b"], True)
    h = lin(h, params["dec1"][0], params["dec1"][1], True)
    x_pred = lin(h, params["dec2"][0], params["dec2"][1], False)

    reg = (jnp.linalg.norm(params["reg0_w"]) + jnp.linalg.norm(params["reg1_w"])) * l2_reg
    return x_pred, y_pred, reg


if __name__ == "__main__":
    # Small shapes consistent with the module's forward
    batch = 8
    input_dim = 64
    hidden_dim = 128
    latent_dim = 32
    output_dim = 16
    l2_reg = 0.001  # l2_regs[k] with k = 3

    key = jax.random.PRNGKey(0)
    pkey, xkey = jax.random.split(key)
    params = make_params(pkey, input_dim, hidden_dim, latent_dim, output_dim)
    x = jax.random.normal(xkey, (batch, input_dim), jnp.float32)

    fwd = jax.jit(functools.partial(autoencoder_forward, l2_reg=l2_reg))
    x_pred, y_pred, reg_loss = fwd(params, x)
    jax.block_until_ready((x_pred, y_pred, reg_loss))

    assert x_pred.shape == (batch, input_dim)
    assert y_pred.shape == (batch, output_dim)
    assert reg_loss.shape == ()

    # Sanity check against a plain-JAX reference
    xr, yr, rr = reference_forward(params, x, l2_reg)
    assert jnp.allclose(x_pred, xr, rtol=1e-2, atol=1e-2)
    assert jnp.allclose(y_pred, yr, rtol=1e-2, atol=1e-2)
    assert jnp.allclose(reg_loss, rr, rtol=1e-3, atol=1e-3)

    print("KERNEL_OK")
</pallas_src>

<mosaic_0001>
module attributes {stable_mosaic.version = 11 : i64} {
  func.func @_fused_autoencoder_kernel(%arg0: memref<8x64xf32, #tpu.memory_space<vmem>>, %arg1: memref<64x128xf32, #tpu.memory_space<vmem>>, %arg2: memref<1x128xf32, #tpu.memory_space<vmem>>, %arg3: memref<128x128xf32, #tpu.memory_space<vmem>>, %arg4: memref<1x128xf32, #tpu.memory_space<vmem>>, %arg5: memref<128x32xf32, #tpu.memory_space<vmem>>, %arg6: memref<1x32xf32, #tpu.memory_space<vmem>>, %arg7: memref<32x128xf32, #tpu.memory_space<vmem>>, %arg8: memref<1x128xf32, #tpu.memory_space<vmem>>, %arg9: memref<128x128xf32, #tpu.memory_space<vmem>>, %arg10: memref<1x128xf32, #tpu.memory_space<vmem>>, %arg11: memref<128x16xf32, #tpu.memory_space<vmem>>, %arg12: memref<1x16xf32, #tpu.memory_space<vmem>>, %arg13: memref<32x128xf32, #tpu.memory_space<vmem>>, %arg14: memref<16x128xf32, #tpu.memory_space<vmem>>, %arg15: memref<1x128xf32, #tpu.memory_space<vmem>>, %arg16: memref<128x128xf32, #tpu.memory_space<vmem>>, %arg17: memref<1x128xf32, #tpu.memory_space<vmem>>, %arg18: memref<128x64xf32, #tpu.memory_space<vmem>>, %arg19: memref<1x64xf32, #tpu.memory_space<vmem>>, %arg20: memref<128x128xf32, #tpu.memory_space<vmem>>, %arg21: memref<32x32xf32, #tpu.memory_space<vmem>>, %arg22: memref<8x64xf32, #tpu.memory_space<vmem>>, %arg23: memref<8x16xf32, #tpu.memory_space<vmem>>, %arg24: memref<1x1xf32, #tpu.memory_space<smem>>) attributes {dimension_semantics = [], scalar_prefetch = 0 : i64, scratch_operands = 0 : i64, tpu.core_type = #tpu.core_type<tc>} {
    %c0 = arith.constant 0 : index
    %c0_0 = arith.constant 0 : index
    %0 = vector.load %arg0[%c0, %c0_0] : memref<8x64xf32, #tpu.memory_space<vmem>>, vector<8x64xf32>
    %c0_1 = arith.constant 0 : index
    %c0_2 = arith.constant 0 : index
    %1 = vector.load %arg1[%c0_1, %c0_2] : memref<64x128xf32, #tpu.memory_space<vmem>>, vector<64x128xf32>
    %cst = arith.constant dense<0.000000e+00> : vector<8x128xf32>
    %2 = tpu.matmul %0, %1, %cst {dimension_numbers = #tpu.dot_dimension_numbers<[1], [0], [0], [1], [0, 0, 1, 1], [], []>} : vector<8x64xf32>, vector<64x128xf32>, vector<8x128xf32> -> vector<8x128xf32>
    %c0_3 = arith.constant 0 : index
    %c0_4 = arith.constant 0 : index
    %3 = vector.load %arg2[%c0_3, %c0_4] : memref<1x128xf32, #tpu.memory_space<vmem>>, vector<1x128xf32>
    %4 = vector.broadcast %3 : vector<1x128xf32> to vector<8x128xf32>
    %5 = arith.addf %2, %4 : vector<8x128xf32>
    %cst_5 = arith.constant 0.000000e+00 : f32
    %6 = vector.broadcast %cst_5 : f32 to vector<8x128xf32>
    %7 = arith.maximumf %5, %6 : vector<8x128xf32>
    %c0_6 = arith.constant 0 : index
    %c0_7 = arith.constant 0 : index
    %8 = vector.load %arg3[%c0_6, %c0_7] : memref<128x128xf32, #tpu.memory_space<vmem>>, vector<128x128xf32>
    %cst_8 = arith.constant dense<0.000000e+00> : vector<8x128xf32>
    %9 = tpu.matmul %7, %8, %cst_8 {dimension_numbers = #tpu.dot_dimension_numbers<[1], [0], [0], [1], [0, 0, 1, 1], [], []>} : vector<8x128xf32>, vector<128x128xf32>, vector<8x128xf32> -> vector<8x128xf32>
    %c0_9 = arith.constant 0 : index
    %c0_10 = arith.constant 0 : index
    %10 = vector.load %arg4[%c0_9, %c0_10] : memref<1x128xf32, #tpu.memory_space<vmem>>, vector<1x128xf32>
    %11 = vector.broadcast %10 : vector<1x128xf32> to vector<8x128xf32>
    %12 = arith.addf %9, %11 : vector<8x128xf32>
    %cst_11 = arith.constant 0.000000e+00 : f32
    %13 = vector.broadcast %cst_11 : f32 to vector<8x128xf32>
    %14 = arith.maximumf %12, %13 : vector<8x128xf32>
    %c0_12 = arith.constant 0 : index
    %c0_13 = arith.constant 0 : index
    %15 = vector.load %arg5[%c0_12, %c0_13] : memref<128x32xf32, #tpu.memory_space<vmem>>, vector<128x32xf32>
    %cst_14 = arith.constant dense<0.000000e+00> : vector<8x32xf32>
    %16 = tpu.matmul %14, %15, %cst_14 {dimension_numbers = #tpu.dot_dimension_numbers<[1], [0], [0], [1], [0, 0, 1, 1], [], []>} : vector<8x128xf32>, vector<128x32xf32>, vector<8x32xf32> -> vector<8x32xf32>
    %c0_15 = arith.constant 0 : index
    %c0_16 = arith.constant 0 : index
    %17 = vector.load %arg6[%c0_15, %c0_16] : memref<1x32xf32, #tpu.memory_space<vmem>>, vector<1x32xf32>
    %18 = vector.broadcast %17 : vector<1x32xf32> to vector<8x32xf32>
    %19 = arith.addf %16, %18 : vector<8x32xf32>
    %c0_17 = arith.constant 0 : index
    %c0_18 = arith.constant 0 : index
    %20 = vector.load %arg7[%c0_17, %c0_18] : memref<32x128xf32, #tpu.memory_space<vmem>>, vector<32x128xf32>
    %cst_19 = arith.constant dense<0.000000e+00> : vector<8x128xf32>
    %21 = tpu.matmul %19, %20, %cst_19 {dimension_numbers = #tpu.dot_dimension_numbers<[1], [0], [0], [1], [0, 0, 1, 1], [], []>} : vector<8x32xf32>, vector<32x128xf32>, vector<8x128xf32> -> vector<8x128xf32>
    %c0_20 = arith.constant 0 : index
    %c0_21 = arith.constant 0 : index
    %22 = vector.load %arg8[%c0_20, %c0_21] : memref<1x128xf32, #tpu.memory_space<vmem>>, vector<1x128xf32>
    %23 = vector.broadcast %22 : vector<1x128xf32> to vector<8x128xf32>
    %24 = arith.addf %21, %23 : vector<8x128xf32>
    %cst_22 = arith.constant 0.000000e+00 : f32
    %25 = vector.broadcast %cst_22 : f32 to vector<8x128xf32>
    %26 = arith.maximumf %24, %25 : vector<8x128xf32>
    %c0_23 = arith.constant 0 : index
    %c0_24 = arith.constant 0 : index
    %27 = vector.load %arg9[%c0_23, %c0_24] : memref<128x128xf32, #tpu.memory_space<vmem>>, vector<128x128xf32>
    %cst_25 = arith.constant dense<0.000000e+00> : vector<8x128xf32>
    %28 = tpu.matmul %26, %27, %cst_25 {dimension_numbers = #tpu.dot_dimension_numbers<[1], [0], [0], [1], [0, 0, 1, 1], [], []>} : vector<8x128xf32>, vector<128x128xf32>, vector<8x128xf32> -> vector<8x128xf32>
    %c0_26 = arith.constant 0 : index
    %c0_27 = arith.constant 0 : index
    %29 = vector.load %arg10[%c0_26, %c0_27] : memref<1x128xf32, #tpu.memory_space<vmem>>, vector<1x128xf32>
    %30 = vector.broadcast %29 : vector<1x128xf32> to vector<8x128xf32>
    %31 = arith.addf %28, %30 : vector<8x128xf32>
    %cst_28 = arith.constant 0.000000e+00 : f32
    %32 = vector.broadcast %cst_28 : f32 to vector<8x128xf32>
    %33 = arith.maximumf %31, %32 : vector<8x128xf32>
    %c0_29 = arith.constant 0 : index
    %c0_30 = arith.constant 0 : index
    %34 = vector.load %arg11[%c0_29, %c0_30] : memref<128x16xf32, #tpu.memory_space<vmem>>, vector<128x16xf32>
    %cst_31 = arith.constant dense<0.000000e+00> : vector<8x16xf32>
    %35 = tpu.matmul %33, %34, %cst_31 {dimension_numbers = #tpu.dot_dimension_numbers<[1], [0], [0], [1], [0, 0, 1, 1], [], []>} : vector<8x128xf32>, vector<128x16xf32>, vector<8x16xf32> -> vector<8x16xf32>
    %c0_32 = arith.constant 0 : index
    %c0_33 = arith.constant 0 : index
    %36 = vector.load %arg12[%c0_32, %c0_33] : memref<1x16xf32, #tpu.memory_space<vmem>>, vector<1x16xf32>
    %37 = vector.broadcast %36 : vector<1x16xf32> to vector<8x16xf32>
    %38 = arith.addf %35, %37 : vector<8x16xf32>
    %c0_34 = arith.constant 0 : index
    %c0_35 = arith.constant 0 : index
    %39 = vector.load %arg13[%c0_34, %c0_35] : memref<32x128xf32, #tpu.memory_space<vmem>>, vector<32x128xf32>
    %cst_36 = arith.constant dense<0.000000e+00> : vector<8x128xf32>
    %40 = tpu.matmul %19, %39, %cst_36 {dimension_numbers = #tpu.dot_dimension_numbers<[1], [0], [0], [1], [0, 0, 1, 1], [], []>} : vector<8x32xf32>, vector<32x128xf32>, vector<8x128xf32> -> vector<8x128xf32>
    %c0_37 = arith.constant 0 : index
    %c0_38 = arith.constant 0 : index
    %41 = vector.load %arg14[%c0_37, %c0_38] : memref<16x128xf32, #tpu.memory_space<vmem>>, vector<16x128xf32>
    %cst_39 = arith.constant dense<0.000000e+00> : vector<8x128xf32>
    %42 = tpu.matmul %38, %41, %cst_39 {dimension_numbers = #tpu.dot_dimension_numbers<[1], [0], [0], [1], [0, 0, 1, 1], [], []>} : vector<8x16xf32>, vector<16x128xf32>, vector<8x128xf32> -> vector<8x128xf32>
    %43 = arith.addf %40, %42 : vector<8x128xf32>
    %c0_40 = arith.constant 0 : index
    %c0_41 = arith.constant 0 : index
    %44 = vector.load %arg15[%c0_40, %c0_41] : memref<1x128xf32, #tpu.memory_space<vmem>>, vector<1x128xf32>
    %45 = vector.broadcast %44 : vector<1x128xf32> to vector<8x128xf32>
    %46 = arith.addf %43, %45 : vector<8x128xf32>
    %cst_42 = arith.constant 0.000000e+00 : f32
    %47 = vector.broadcast %cst_42 : f32 to vector<8x128xf32>
    %48 = arith.maximumf %46, %47 : vector<8x128xf32>
    %c0_43 = arith.constant 0 : index
    %c0_44 = arith.constant 0 : index
    %49 = vector.load %arg16[%c0_43, %c0_44] : memref<128x128xf32, #tpu.memory_space<vmem>>, vector<128x128xf32>
    %cst_45 = arith.constant dense<0.000000e+00> : vector<8x128xf32>
    %50 = tpu.matmul %48, %49, %cst_45 {dimension_numbers = #tpu.dot_dimension_numbers<[1], [0], [0], [1], [0, 0, 1, 1], [], []>} : vector<8x128xf32>, vector<128x128xf32>, vector<8x128xf32> -> vector<8x128xf32>
    %c0_46 = arith.constant 0 : index
    %c0_47 = arith.constant 0 : index
    %51 = vector.load %arg17[%c0_46, %c0_47] : memref<1x128xf32, #tpu.memory_space<vmem>>, vector<1x128xf32>
    %52 = vector.broadcast %51 : vector<1x128xf32> to vector<8x128xf32>
    %53 = arith.addf %50, %52 : vector<8x128xf32>
    %cst_48 = arith.constant 0.000000e+00 : f32
    %54 = vector.broadcast %cst_48 : f32 to vector<8x128xf32>
    %55 = arith.maximumf %53, %54 : vector<8x128xf32>
    %c0_49 = arith.constant 0 : index
    %c0_50 = arith.constant 0 : index
    %56 = vector.load %arg18[%c0_49, %c0_50] : memref<128x64xf32, #tpu.memory_space<vmem>>, vector<128x64xf32>
    %cst_51 = arith.constant dense<0.000000e+00> : vector<8x64xf32>
    %57 = tpu.matmul %55, %56, %cst_51 {dimension_numbers = #tpu.dot_dimension_numbers<[1], [0], [0], [1], [0, 0, 1, 1], [], []>} : vector<8x128xf32>, vector<128x64xf32>, vector<8x64xf32> -> vector<8x64xf32>
    %c0_52 = arith.constant 0 : index
    %c0_53 = arith.constant 0 : index
    %58 = vector.load %arg19[%c0_52, %c0_53] : memref<1x64xf32, #tpu.memory_space<vmem>>, vector<1x64xf32>
    %59 = vector.broadcast %58 : vector<1x64xf32> to vector<8x64xf32>
    %60 = arith.addf %57, %59 : vector<8x64xf32>
    %c0_54 = arith.constant 0 : index
    %c0_55 = arith.constant 0 : index
    %61 = vector.load %arg22[%c0_54, %c0_55] : memref<8x64xf32, #tpu.memory_space<vmem>>, vector<8x64xf32>
    tpu.vector_store %arg22[%c0_54, %c0_55], %60 {strides = array<i32>} : memref<8x64xf32, #tpu.memory_space<vmem>>, vector<8x64xf32>,
    %c0_56 = arith.constant 0 : index
    %c0_57 = arith.constant 0 : index
    %62 = vector.load %arg23[%c0_56, %c0_57] : memref<8x16xf32, #tpu.memory_space<vmem>>, vector<8x16xf32>
    tpu.vector_store %arg23[%c0_56, %c0_57], %38 {strides = array<i32>} : memref<8x16xf32, #tpu.memory_space<vmem>>, vector<8x16xf32>,
    %c0_58 = arith.constant 0 : index
    %c0_59 = arith.constant 0 : index
    %63 = vector.load %arg20[%c0_58, %c0_59] : memref<128x128xf32, #tpu.memory_space<vmem>>, vector<128x128xf32>
    %c0_60 = arith.constant 0 : index
    %c0_61 = arith.constant 0 : index
    %64 = vector.load %arg21[%c0_60, %c0_61] : memref<32x32xf32, #tpu.memory_space<vmem>>, vector<32x32xf32>
    %65 = arith.mulf %63, %63 : vector<128x128xf32>
    %66 = vector.shape_cast %65 : vector<128x128xf32> to vector<1x128x128xf32>
    %cst_62 = arith.constant dense<0.000000e+00> : vector<1xf32>
    %67 = vector.multi_reduction <add>, %66, %cst_62 [1, 2] : vector<1x128x128xf32> to vector<1xf32>
    %68 = vector.shape_cast %67 : vector<1xf32> to vector<1x1x1xf32>
    %69 = vector.extract %68[0, 0, 0] : f32 from vector<1x1x1xf32>
    %70 = math.sqrt %69 : f32
    %71 = arith.mulf %64, %64 : vector<32x32xf32>
    %72 = vector.shape_cast %71 : vector<32x32xf32> to vector<1x32x32xf32>
    %cst_63 = arith.constant dense<0.000000e+00> : vector<1xf32>
    %73 = vector.multi_reduction <add>, %72, %cst_63 [1, 2] : vector<1x32x32xf32> to vector<1xf32>
    %74 = vector.shape_cast %73 : vector<1xf32> to vector<1x1x1xf32>
    %75 = vector.extract %74[0, 0, 0] : f32 from vector<1x1x1xf32>
    %76 = math.sqrt %75 : f32
    %77 = arith.addf %70, %76 : f32
    %cst_64 = arith.constant 1.000000e-03 : f32
    %78 = arith.mulf %77, %cst_64 : f32
    %c0_65 = arith.constant 0 : index
    %c0_66 = arith.constant 0 : index
    %79 = memref.load %arg24[%c0_65, %c0_66] : memref<1x1xf32, #tpu.memory_space<smem>>
    memref.store %78, %arg24[%c0_65, %c0_66] : memref<1x1xf32, #tpu.memory_space<smem>>
    return
  }
}

</mosaic_0001>

<bundles_post_ra>
// kernel: autoencoder_forward.1
= control target key start
LH: loop header
LB: loop body
LE: loop exit
PB: predicated region body
PF: predicated region fallthrough
CT: control target
= control target key end

     0   :  { %s2634_s0 = inlined_call_operand.vmem [shape: f32[8,64], index: 0, kind: input, shape index: {}]   ;;  %s2635_s1 = inlined_call_operand.hbm [shape: f32[64,128], index: 1, kind: input, shape index: {}]   ;;  %s2636_s2 = inlined_call_operand.hbm [shape: f32[1,128], index: 2, kind: input, shape index: {}]   ;;  %s2637_s3 = inlined_call_operand.vmem [shape: f32[128,128], index: 3, kind: input, shape index: {}]   ;;  %s2638_s4 = inlined_call_operand.hbm [shape: f32[1,128], index: 4, kind: input, shape index: {}]   ;;  %s2639_s5 = inlined_call_operand.vmem [shape: f32[128,32], index: 5, kind: input, shape index: {}]   ;;  %s2640_s6 = inlined_call_operand.vmem [shape: f32[1,32], index: 6, kind: input, shape index: {}]   ;;  %s2641_s7 = inlined_call_operand.hbm [shape: f32[32,128], index: 7, kind: input, shape index: {}]   ;;  %s2642_s8 = inlined_call_operand.vmem [shape: f32[1,128], index: 8, kind: input, shape index: {}]   ;;  %s2643_s9 = inlined_call_operand.vmem [shape: f32[128,128], index: 9, kind: input, shape index: {}]   ;;  %s2644_s10 = inlined_call_operand.vmem [shape: f32[1,128], index: 10, kind: input, shape index: {}]   ;;  %s2645_s11 = inlined_call_operand.vmem [shape: f32[128,16], index: 11, kind: input, shape index: {}]   ;;  %s2646_s12 = inlined_call_operand.vmem [shape: f32[1,16], index: 12, kind: input, shape index: {}]   ;;  %s2647_s13 = inlined_call_operand.hbm [shape: f32[32,128], index: 13, kind: input, shape index: {}]   ;;  %s2648_s14 = inlined_call_operand.hbm [shape: f32[16,128], index: 14, kind: input, shape index: {}]   ;;  %s2649_s15 = inlined_call_operand.hbm [shape: f32[1,128], index: 15, kind: input, shape index: {}]   ;;  %s2650_s16 = inlined_call_operand.vmem [shape: f32[128,128], index: 16, kind: input, shape index: {}]   ;;  %s2651_s17 = inlined_call_operand.hbm [shape: f32[1,128], index: 17, kind: input, shape index: {}]   ;;  %s2652_s18 = inlined_call_operand.vmem [shape: f32[128,64], index: 18, kind: input, shape index: {}]   ;;  %s2653_s19 = inlined_call_operand.hbm [shape: f32[1,64], index: 19, kind: input, shape index: {}]   ;;  %s2654_s20 = inlined_call_operand.vmem [shape: f32[128,128], index: 20, kind: input, shape index: {}]   ;;  %s2655_s21 = inlined_call_operand.hbm [shape: f32[32,32], index: 21, kind: input, shape index: {}]   ;;  %s2656_s22 = inlined_call_operand.hbm [shape: f32[8,64], index: 22, kind: output, shape index: {0}]   ;;  %s2657_s23 = inlined_call_operand.hbm [shape: f32[8,16], index: 23, kind: output, shape index: {1}]   ;;  %s2658_s24 = inlined_call_operand.hbm [shape: f32[1,1], index: 24, kind: output, shape index: {2}]  }
   0x1   :  { %2661 = sst [smem:[#allocation33_spill]] %s2634_s0 }
   0x2   :  { %2662 = sst [smem:[#allocation34_spill]] %s2635_s1 }
   0x3   :  { %2663 = sst [smem:[#allocation35_spill]] %s2636_s2 }
   0x4   :  { %2664 = sst [smem:[#allocation36_spill]] %s2637_s3 }
   0x5   :  { %2665 = sst [smem:[#allocation37_spill]] %s2638_s4 }
   0x6   :  { %2666 = sst [smem:[#allocation38_spill]] %s2639_s5 }
   0x7   :  { %2667 = sst [smem:[#allocation39_spill]] %s2640_s6 }
   0x8   :  { %2668 = sst [smem:[#allocation40_spill]] %s2641_s7 }
   0x9   :  { %2669 = sst [smem:[#allocation41_spill]] %s2642_s8 }
   0xa   :  { %30 = vsyncpa [#allocation3], 0 }
   0xb   :  { %31 = vsyncpa [#allocation7], 0 }
   0xc   :  { %32 = vsyncpa [#allocation10], 0 }
   0xd   :  { %33 = vsyncpa [#allocation13], 0 }
   0xe   :  { %34 = vsyncpa [#allocation16], 0 }
   0xf   :  { %35 = vsyncpa [#allocation19], 0 }
  0x10   :  { %36 = vsyncpa [#allocation4], 0 }
  0x11   :  { %37 = vsyncpa [#allocation22], 0 }
  0x12   :  { %38 = vsyncpa [#allocation5], 0  ;;  %s1941_s5 = smov [#allocation6]  }
  0x13   :  { %s59_s26 = sshll.u32 %s1941_s5, 4  ;;  %s60_s26 = int_to_ptr.vmem [resolvable:$true] %s59_s26 }
  0x14   :  { %s1683_s27 = scalar_lea.vmem %s60_s26, 16  ;;  %s1687_s28 = scalar_lea.vmem %s60_s26, 32 }
  0x15   :  { %p1684_p0 = scmp.ne.s32.totalorder %s60_s26, %s1683_s27  ;;  %p1688_p1 = scmp.lt.s32.totalorder %s60_s26, %s60_s26 }
  0x16   :  { %p1689_p2 = scmp.lt.s32.totalorder %s1687_s28, %s1683_s27 }
  0x18   :  { %p1690_p3 = por %p1689_p2, %p1688_p1 }
  0x1a   :  { %p1691_p4 = pnand %p1690_p3, %p1684_p0 }
  0x1c   :  { %1694 = shalt.err (!%p1691_p4)
}
  0x1d   :  { %s2670_s29 = sld [smem:[#allocation35_spill]]  ;;  %s1942_s0 = smov [#allocation9]  }
  0x1e   :  { %s84_s7 = sshll.u32 %s1942_s0, 4  ;;  %s1943_s30 = smov [#allocation12]   ;;  %s85_s7 = int_to_ptr.vmem [resolvable:$true] %s84_s7 }
  0x1f   :  { %s118_s3 = sshll.u32 %s1943_s30, 4  ;;  %s1703_s25 = scalar_lea.vmem %s85_s7, 512  ;;  %s119_s3 = int_to_ptr.vmem [resolvable:$true] %s118_s3 }
  0x20   :  { %p1704_p5 = scmp.ne.s32.totalorder %s85_s7, %s1703_s25  ;;  %p1708_p6 = scmp.lt.s32.totalorder %s85_s7, %s85_s7 }
  0x21   :  { %p1709_p7 = scmp.lt.s32.totalorder %s1703_s25, %s1703_s25 }
  0x23   :  { %62 = dma.hbm_to_vmem [thread:$0]  %s2670_s29, 16, %s60_s26, [#allocation7]  }
  0x24   :  { %p1710_p8 = por %p1709_p7, %p1708_p6 }
  0x26   :  { %p1711_p9 = pnand %p1710_p8, %p1704_p5 }
  0x28   :  { %1714 = shalt.err (!%p1711_p9)
}
  0x29   :  { %s1944_s8 = smov 128   ;;  %s1945_s4 = smov 8  }
  0x2a   :  { %s2671_s26 = sld [smem:[#allocation40_spill]]  ;;  %s1723_s27 = scalar_lea.vmem %s119_s3, 256 }
  0x2b   :  { %p1724_p10 = scmp.ne.s32.totalorder %s119_s3, %s1723_s27  ;;  %p1728_p11 = scmp.lt.s32.totalorder %s119_s3, %s119_s3 }
  0x2c   :  { %p1729_p12 = scmp.lt.s32.totalorder %s1723_s27, %s1723_s27 }
  0x2e   :  { %p1730_p13 = por %p1729_p12, %p1728_p11 }
  0x30   :  { %90 = dma.hbm_to_vmem [thread:$0]  %s2671_s26, 512, %s85_s7, [#allocation10], %s1944_s8, %s1944_s8, %s1945_s4  }
  0x31   :  { %p1731_p0 = pnand %p1730_p13, %p1724_p10 }
  0x33   :  { %1734 = shalt.err (!%p1731_p0)
}
  0x34   :  { %124 = dma.hbm_to_vmem [thread:$0]  %s2648_s14, 256, %s119_s3, [#allocation13], %s1944_s8, %s1944_s8, %s1945_s4  }
  0x35   :  { %s1946_s2 = smov [#allocation15]   ;;  %s1947_s0 = smov [#allocation2]  }
  0x36   :  { %s143_s29 = sshll.u32 %s1946_s2, 4  ;;  %s46_s7 = sshll.u32 %s1947_s0, 4  ;;  %s144_s29 = int_to_ptr.vmem [resolvable:$true] %s143_s29  ;;  %s47_s7 = int_to_ptr.vmem [resolvable:$true] %s46_s7 }
  0x37   :  { %s1743_s30 = scalar_lea.vmem %s144_s29, 16  ;;  %s1747_s25 = scalar_lea.vmem %s144_s29, 32 }
  0x38   :  { %p1744_p1 = scmp.ne.s32.totalorder %s144_s29, %s1743_s30  ;;  %p1748_p2 = scmp.lt.s32.totalorder %s144_s29, %s144_s29 }
  0x39   :  { %p1749_p3 = scmp.lt.s32.totalorder %s1747_s25, %s1743_s30 }
  0x3b   :  { %p1750_p4 = por %p1749_p3, %p1748_p2 }
  0x3d   :  { %p1751_p5 = pnand %p1750_p4, %p1744_p1 }
  0x3f   :  { %1754 = shalt.err (!%p1751_p5)
}
  0x40   :  { %146 = dma.hbm_to_vmem [thread:$0]  %s2651_s17, 16, %s144_s29, [#allocation16]  }
  0x41   :  { %s1763_s26 = scalar_lea.vmem %s47_s7, 1024  ;;  %p1768_p7 = scmp.lt.s32.totalorder %s47_s7, %s47_s7 }
  0x42   :  { %p1764_p6 = scmp.ne.s32.totalorder %s47_s7, %s1763_s26  ;;  %p1769_p8 = scmp.lt.s32.totalorder %s1763_s26, %s1763_s26 }
  0x44   :  { %p1770_p9 = por %p1769_p8, %p1768_p7 }
  0x46   :  { %p1771_p10 = pnand %p1770_p9, %p1764_p6 }
  0x48   :  { %1774 = shalt.err (!%p1771_p10)
}
  0x49   :  { %s2672_s27 = sld [smem:[#allocation34_spill]]  ;;  %s1948_s28 = smov [#allocation8]  }
  0x4a   :  { %s71_s6 = sshll.u32 %s1948_s28, 4  ;;  %s1949_s2 = smov [#allocation11]   ;;  %s72_s6 = int_to_ptr.vmem [resolvable:$true] %s71_s6 }
  0x4b   :  { %s106_s17 = sshll.u32 %s1949_s2, 4  ;;  %s1783_s29 = scalar_lea.vmem %s72_s6, 16  ;;  %s107_s17 = int_to_ptr.vmem [resolvable:$true] %s106_s17 }
  0x4c   :  { %p1784_p11 = scmp.ne.s32.totalorder %s72_s6, %s1783_s29  ;;  %s1787_s0 = scalar_lea.vmem %s72_s6, 32 }
  0x4d   :  { %p1788_p12 = scmp.lt.s32.totalorder %s72_s6, %s72_s6  ;;  %p1789_p13 = scmp.lt.s32.totalorder %s1787_s0, %s1783_s29 }
  0x4f   :  { %52 = dma.hbm_to_vmem [thread:$0]  %s2672_s27, 1024, %s47_s7, [#allocation3], %s1944_s8, %s1944_s8, %s1945_s4  }
  0x50   :  { %p1790_p0 = por %p1789_p13, %p1788_p12 }
  0x52   :  { %p1791_p1 = pnand %p1790_p0, %p1784_p11 }
  0x54   :  { %1794 = shalt.err (!%p1791_p1)
}
  0x55   :  { %s2673_s1 = sld [smem:[#allocation37_spill]]  ;;  %s1803_s5 = scalar_lea.vmem %s107_s17, 512 }
  0x56   :  { %p1804_p2 = scmp.ne.s32.totalorder %s107_s17, %s1803_s5  ;;  %p1808_p3 = scmp.lt.s32.totalorder %s107_s17, %s107_s17 }
  0x57   :  { %p1809_p4 = scmp.lt.s32.totalorder %s1803_s5, %s1803_s5 }
  0x59   :  { %p1810_p5 = por %p1809_p4, %p1808_p3 }
  0x5b   :  { %74 = dma.hbm_to_vmem [thread:$0]  %s2673_s1, 16, %s72_s6, [#allocation7]  }
  0x5c   :  { %p1811_p6 = pnand %p1810_p5, %p1804_p2 }
  0x5e   :  { %1814 = shalt.err (!%p1811_p6)
}
  0x5f   :  { %112 = dma.hbm_to_vmem [thread:$0]  %s2647_s13, 512, %s107_s17, [#allocation10], %s1944_s8, %s1944_s8, %s1945_s4  }
  0x60   :  { %s1950_s14 = smov [#allocation14]   ;;  %s1951_s27 = smov [#allocation17]  }
  0x61   :  { %s131_s3 = sshll.u32 %s1950_s14, 4  ;;  %s155_s28 = sshll.u32 %s1951_s27, 4  ;;  %s132_s3 = int_to_ptr.vmem [resolvable:$true] %s131_s3  ;;  %s156_s28 = int_to_ptr.vmem [resolvable:$true] %s155_s28 }
  0x62   :  { %s1823_s6 = scalar_lea.vmem %s132_s3, 16  ;;  %s1827_s2 = scalar_lea.vmem %s132_s3, 32 }
  0x63   :  { %p1824_p7 = scmp.ne.s32.totalorder %s132_s3, %s1823_s6  ;;  %p1828_p8 = scmp.lt.s32.totalorder %s132_s3, %s132_s3 }
  0x64   :  { %p1829_p9 = scmp.lt.s32.totalorder %s1827_s2, %s1823_s6 }
  0x66   :  { %p1830_p10 = por %p1829_p9, %p1828_p8 }
  0x68   :  { %p1831_p11 = pnand %p1830_p10, %p1824_p7 }
  0x6a   :  { %1834 = shalt.err (!%p1831_p11)
}
  0x6b   :  { %134 = dma.hbm_to_vmem [thread:$0]  %s2649_s15, 16, %s132_s3, [#allocation13]  }
  0x6c   :  { %s1843_s30 = scalar_lea.vmem %s156_s28, 16  ;;  %s1847_s13 = scalar_lea.vmem %s156_s28, 32 }
  0x6d   :  { %p1844_p12 = scmp.ne.s32.totalorder %s156_s28, %s1843_s30  ;;  %p1848_p13 = scmp.lt.s32.totalorder %s156_s28, %s156_s28 }
  0x6e   :  { %p1849_p0 = scmp.lt.s32.totalorder %s1847_s13, %s1843_s30 }
  0x70   :  { %p1850_p1 = por %p1849_p0, %p1848_p13 }
  0x72   :  { %p1851_p2 = pnand %p1850_p1, %p1844_p12 }
  0x74   :  { %1854 = shalt.err (!%p1851_p2)
}
  0x75   :  { %158 = dma.hbm_to_vmem [thread:$0]  %s2653_s19, 16, %s156_s28, [#allocation16]  }
  0x76   :  { %s1952_s1 = smov [#allocation18]  }
  0x77   :  { %s166_s5 = sshll.u32 %s1952_s1, 4  ;;  %s167_s5 = int_to_ptr.vmem [resolvable:$true] %s166_s5 }
  0x78   :  { %s1863_s7 = scalar_lea.vmem %s167_s5, 512  ;;  %p1868_p4 = scmp.lt.s32.totalorder %s167_s5, %s167_s5 }
  0x79   :  { %p1864_p3 = scmp.ne.s32.totalorder %s167_s5, %s1863_s7  ;;  %p1869_p5 = scmp.lt.s32.totalorder %s1863_s7, %s1863_s7 }
  0x7b   :  { %p1870_p6 = por %p1869_p5, %p1868_p4 }
  0x7d   :  { %p1871_p7 = pnand %p1870_p6, %p1864_p3 }
  0x7f   :  { %1874 = shalt.err (!%p1871_p7)
}
  0x80   :  { %172 = dma.hbm_to_vmem [thread:$0]  %s2655_s21, 512, %s167_s5, [#allocation19], %s1944_s8, %s1944_s8, %s1945_s4  }
  0x81   :  { %1923 = dma.done.wait [#allocation3], 1024  }
  0x82   :  { %1924 = vsyncadd [#allocation3], 4294966272 }
  0x83   :  { %1925 = dma.done.wait [#allocation7], 32  }
  0x84   :  { %1926 = vsyncadd [#allocation7], 4294967264 }
  0x85   :  { %1927 = dma.done.wait [#allocation10], 1024  }
  0x86   :  { %1928 = vsyncadd [#allocation10], 4294966272 }
  0x87   :  { %1929 = dma.done.wait [#allocation13], 272  }
  0x88   :  { %1930 = vsyncadd [#allocation13], 4294967024 }
  0x89   :  { %1931 = dma.done.wait [#allocation16], 32  }
  0x8a   :  { %1932 = vsyncadd [#allocation16], 4294967264 }
  0x8b   :  { %1933 = dma.done.wait [#allocation19], 512  }
  0x8c   :  { %1934 = vsyncadd [#allocation19], 4294966784  ;;  %v1953_v0 = vmov 0.0   ;;  %vm1954_vm0 = vmmov 0   ;;  %v211_v1 = vld [vmem:[#allocation2 + $0x38] sm:$0xff]  ;;  %v210_v2 = vld [vmem:[#allocation2 + $0x30] sm:$0xff] }
  0x8d   :  { %1388 = vmatprep.subr.mxu0 %v1953_v0  ;;  %1404 = vmatprep.mubr.msk.f32.mxu0 %vm1954_vm0, %v1953_v0  ;;  %v209_v3 = vld [vmem:[#allocation2 + $0x28] sm:$0xff]  ;;  %s2674_s8 = sld [smem:[#allocation36_spill]]  ;;  %v208_v6 = vld [vmem:[#allocation2 + $0x20] sm:$0xff]  ;;  %v207_v8 = vld [vmem:[#allocation2 + $0x18] sm:$0xff]  ;;  %vm219_vm1 = vcmask 523264   ;;  %vm492_vm2 = vcmask 261120  }
  0x8e   :  { %1407 = vmatprep.subr.mxu1 %v1953_v0  ;;  %1439 = vmatprep.mubr.msk.f32.mxu1 %vm1954_vm0, %v1953_v0  ;;  %v206_v10 = vld [vmem:[#allocation2 + $0x10] sm:$0xff]  ;;  %v205_v12 = vld [vmem:[#allocation2 + $0x8] sm:$0xff]  ;;  %v204_v14 = vld [vmem:[#allocation2] sm:$0xff]  ;;  %s2675_s25 = sld [smem:[#allocation33_spill]]  ;;  %vm760_vm3 = vcmask 130048  }
  0x8f   :  { %1389 = vmatpush3.msra.mxu0 %v211_v1  ;;  %s2676_s7 = sld [smem:[#allocation38_spill]]  ;;  %v1251_v39 = vld [vmem:[#allocation6] ss:$0 sm:$0xff]  ;;  %v483_v48 = vld [vmem:[#allocation9 + $0x10] sm:$0xff]  ;;  %v1253_v49 = vld [vmem:[#allocation8] ss:$0 sm:$0xff] }
  0x90   :  { %1390 = vmatprep.subr.mxu0 %v1953_v0  ;;  %v484_v47 = vld [vmem:[#allocation9 + $0x18] sm:$0xff]  ;;  %v482_v54 = vld [vmem:[#allocation9 + $0x8] sm:$0xff]  ;;  %v481_v55 = vld [vmem:[#allocation9] sm:$0xff]  ;;  %s2677_s2 = sld [smem:[#allocation39_spill]] }
  0x91   :  { %1391 = vmatpush3.msra.mxu0 %v210_v2  ;;  %v582_v59 = vld [vmem:[%s2643_s9 + $0x78] sm:$0xff]  ;;  %v581_v61 = vld [vmem:[%s2643_s9 + $0x70] sm:$0xff]  ;;  %v580_v62 = vld [vmem:[%s2643_s9 + $0x68] sm:$0xff] }
  0x92   :  { %1392 = vmatprep.subr.mxu0 %v1953_v0  ;;  %v579_v63 = vld [vmem:[%s2643_s9 + $0x60] sm:$0xff]  ;;  %v578_v1 = vld [vmem:[%s2643_s9 + $0x58] sm:$0xff]  ;;  %v577_v2 = vld [vmem:[%s2643_s9 + $0x50] sm:$0xff] }
  0x93   :  { %v309_v4 = vld [vmem:[%s2674_s8 + $0x78] sm:$0xff]  ;;  %v308_v5 = vld [vmem:[%s2674_s8 + $0x70] sm:$0xff]  ;;  %1393 = vmatpush3.msra.mxu0 %v209_v3  ;;  %v307_v7 = vld [vmem:[%s2674_s8 + $0x68] sm:$0xff] }
  0x94   :  { %1408 = vmatpush3.msra.mxu1 %v309_v4  ;;  %1394 = vmatprep.subr.mxu0 %v1953_v0  ;;  %v306_v9 = vld [vmem:[%s2674_s8 + $0x60] sm:$0xff]  ;;  %v305_v11 = vld [vmem:[%s2674_s8 + $0x58] sm:$0xff]  ;;  %v304_v13 = vld [vmem:[%s2674_s8 + $0x50] sm:$0xff] }
  0x95   :  { %1409 = vmatprep.subr.mxu1 %v1953_v0  ;;  %1395 = vmatpush3.msra.mxu0 %v208_v6  ;;  %v203_v15 = vld [vmem:[%s2675_s25] sm:$0xff]  ;;  %v303_v16 = vld [vmem:[%s2674_s8 + $0x48] sm:$0xff]  ;;  %v301_v18 = vld [vmem:[%s2674_s8 + $0x38] sm:$0xff] }
  0x96   :  { %1410 = vmatpush3.msra.mxu1 %v308_v5  ;;  %1396 = vmatprep.subr.mxu0 %v1953_v0  ;;  %v302_v17 = vld [vmem:[%s2674_s8 + $0x40] sm:$0xff]  ;;  %v300_v19 = vld [vmem:[%s2674_s8 + $0x30] sm:$0xff]  ;;  %v299_v20 = vld [vmem:[%s2674_s8 + $0x28] sm:$0xff] }
  0x97   :  { %1411 = vmatprep.subr.mxu1 %v1953_v0  ;;  %1397 = vmatpush3.msra.mxu0 %v207_v8  ;;  %v298_v21 = vld [vmem:[%s2674_s8 + $0x20] sm:$0xff]  ;;  %v297_v22 = vld [vmem:[%s2674_s8 + $0x18] sm:$0xff]  ;;  %v296_v23 = vld [vmem:[%s2674_s8 + $0x10] sm:$0xff] }
  0x98   :  { %1412 = vmatpush3.msra.mxu1 %v307_v7  ;;  %1398 = vmatprep.subr.mxu0 %v1953_v0  ;;  %v295_v24 = vld [vmem:[%s2674_s8 + $0x8] sm:$0xff]  ;;  %v294_v25 = vld [vmem:[%s2674_s8] sm:$0xff]  ;;  %v403_v26 = vld [vmem:[%s2676_s7 + $0x78] sm:$0xff] }
  0x99   :  { %1413 = vmatprep.subr.mxu1 %v1953_v0  ;;  %1399 = vmatpush3.msra.mxu0 %v206_v10  ;;  %v402_v27 = vld [vmem:[%s2676_s7 + $0x70] sm:$0xff]  ;;  %v401_v28 = vld [vmem:[%s2676_s7 + $0x68] sm:$0xff]  ;;  %v400_v29 = vld [vmem:[%s2676_s7 + $0x60] sm:$0xff] }
  0x9a   :  { %1414 = vmatpush3.msra.mxu1 %v306_v9  ;;  %1400 = vmatprep.subr.mxu0 %v1953_v0  ;;  %v399_v30 = vld [vmem:[%s2676_s7 + $0x58] sm:$0xff]  ;;  %v398_v31 = vld [vmem:[%s2676_s7 + $0x50] sm:$0xff]  ;;  %v397_v32 = vld [vmem:[%s2676_s7 + $0x48] sm:$0xff] }
  0x9b   :  { %1415 = vmatprep.subr.mxu1 %v1953_v0  ;;  %1401 = vmatpush3.msra.mxu0 %v205_v12  ;;  %v396_v33 = vld [vmem:[%s2676_s7 + $0x40] sm:$0xff]  ;;  %v395_v34 = vld [vmem:[%s2676_s7 + $0x38] sm:$0xff]  ;;  %v394_v35 = vld [vmem:[%s2676_s7 + $0x30] sm:$0xff] }
  0x9c   :  { %1416 = vmatpush3.msra.mxu1 %v305_v11  ;;  %1402 = vmatprep.subr.mxu0 %v1953_v0  ;;  %v393_v36 = vld [vmem:[%s2676_s7 + $0x28] sm:$0xff]  ;;  %v392_v37 = vld [vmem:[%s2676_s7 + $0x20] sm:$0xff]  ;;  %v391_v38 = vld [vmem:[%s2676_s7 + $0x18] sm:$0xff] }
  0x9d   :  { %1417 = vmatprep.subr.mxu1 %v1953_v0  ;;  %1403 = vmatpush3.msra.mxu0 %v204_v14  ;;  %v390_v44 = vld [vmem:[%s2676_s7 + $0x10] sm:$0xff]  ;;  %v389_v45 = vld [vmem:[%s2676_s7 + $0x8] sm:$0xff]  ;;  %v388_v46 = vld [vmem:[%s2676_s7] sm:$0xff] }
  0x9e   :  { %1418 = vmatpush3.msra.mxu1 %v304_v13  ;;  %1405 = vmatmul.mubr.msk.f32.vlgmr.msra.gmra.mxu0 %vm219_vm1, %v203_v15  ;;  %v1254_v56 = vld [vmem:[%s2677_s2] ss:$0 sm:$0xff]  ;;  %v576_v3 = vld [vmem:[%s2643_s9 + $0x48] sm:$0xff]  ;;  %v574_v5 = vld [vmem:[%s2643_s9 + $0x38] sm:$0xff] }
  0x9f   :  { %1419 = vmatprep.subr.mxu1 %v1953_v0  ;;  %1442 = vmatprep.subr.mxu0 %v1953_v0  ;;  %v575_v4 = vld [vmem:[%s2643_s9 + $0x40] sm:$0xff]  ;;  %v573_v6 = vld [vmem:[%s2643_s9 + $0x30] sm:$0xff]  ;;  %v572_v7 = vld [vmem:[%s2643_s9 + $0x28] sm:$0xff] }
  0xa0   :  { %1420 = vmatpush3.msra.mxu1 %v303_v16  ;;  %1474 = vmatprep.mubr.msk.f32.mxu0 %vm1954_vm0, %v1953_v0  ;;  %v571_v8 = vld [vmem:[%s2643_s9 + $0x20] sm:$0xff]  ;;  %v570_v9 = vld [vmem:[%s2643_s9 + $0x18] sm:$0xff]  ;;  %v569_v10 = vld [vmem:[%s2643_s9 + $0x10] sm:$0xff] }
  0xa1   :  { %1421 = vmatprep.subr.mxu1 %v1953_v0  ;;  %1443 = vmatpush3.msra.mxu0 %v403_v26  ;;  %v568_v11 = vld [vmem:[%s2643_s9 + $0x8] sm:$0xff]  ;;  %v567_v12 = vld [vmem:[%s2643_s9] sm:$0xff]  ;;  %v676_v13 = vld [vmem:[%s2645_s11 + $0x78] sm:$0xff]  ;;  %s2678_s9 = sld [smem:[#allocation41_spill]] }
  0xa2   :  { %1422 = vmatpush3.msra.mxu1 %v302_v17  ;;  %1444 = vmatprep.subr.mxu0 %v1953_v0  ;;  %v675_v14 = vld [vmem:[%s2645_s11 + $0x70] sm:$0xff]  ;;  %v674_v15 = vld [vmem:[%s2645_s11 + $0x68] sm:$0xff]  ;;  %v673_v16 = vld [vmem:[%s2645_s11 + $0x60] sm:$0xff] }
  0xa3   :  { %1423 = vmatprep.subr.mxu1 %v1953_v0  ;;  %1445 = vmatpush3.msra.mxu0 %v402_v27  ;;  %v672_v17 = vld [vmem:[%s2645_s11 + $0x58] sm:$0xff] }
  0xa4   :  { %1424 = vmatpush3.msra.mxu1 %v301_v18  ;;  %1446 = vmatprep.subr.mxu0 %v1953_v0  ;;  %v671_v18 = vld [vmem:[%s2645_s11 + $0x50] sm:$0xff] }
  0xa5   :  { %1425 = vmatprep.subr.mxu1 %v1953_v0  ;;  %1447 = vmatpush3.msra.mxu0 %v401_v28 }
  0xa6   :  { %1426 = vmatpush3.msra.mxu1 %v300_v19  ;;  %1448 = vmatprep.subr.mxu0 %v1953_v0  ;;  %v670_v19 = vld [vmem:[%s2645_s11 + $0x48] sm:$0xff] }
  0xa7   :  { %1427 = vmatprep.subr.mxu1 %v1953_v0  ;;  %1449 = vmatpush3.msra.mxu0 %v400_v29  ;;  %v1255_v26 = vld [vmem:[%s2678_s9] ss:$0 sm:$0xff] }
  0xa8   :  { %1428 = vmatpush3.msra.mxu1 %v299_v20  ;;  %1450 = vmatprep.subr.mxu0 %v1953_v0  ;;  %v669_v20 = vld [vmem:[%s2645_s11 + $0x40] sm:$0xff] }
  0xa9   :  { %1429 = vmatprep.subr.mxu1 %v1953_v0  ;;  %1451 = vmatpush3.msra.mxu0 %v399_v30 }
  0xaa   :  { %1430 = vmatpush3.msra.mxu1 %v298_v21  ;;  %1452 = vmatprep.subr.mxu0 %v1953_v0  ;;  %v668_v21 = vld [vmem:[%s2645_s11 + $0x38] sm:$0xff] }
  0xab   :  { %1431 = vmatprep.subr.mxu1 %v1953_v0  ;;  %1453 = vmatpush3.msra.mxu0 %v398_v31  ;;  %v663_v31 = vld [vmem:[%s2645_s11 + $0x10] sm:$0xff] }
  0xac   :  { %1432 = vmatpush3.msra.mxu1 %v297_v22  ;;  %1454 = vmatprep.subr.mxu0 %v1953_v0  ;;  %v667_v22 = vld [vmem:[%s2645_s11 + $0x30] sm:$0xff] }
  0xad   :  { %1433 = vmatprep.subr.mxu1 %v1953_v0  ;;  %1455 = vmatpush3.msra.mxu0 %v397_v32  ;;  %v662_v32 = vld [vmem:[%s2645_s11 + $0x8] sm:$0xff] }
  0xae   :  { %1434 = vmatpush3.msra.mxu1 %v296_v23  ;;  %1456 = vmatprep.subr.mxu0 %v1953_v0  ;;  %v666_v23 = vld [vmem:[%s2645_s11 + $0x28] sm:$0xff] }
  0xaf   :  { %1435 = vmatprep.subr.mxu1 %v1953_v0  ;;  %1457 = vmatpush3.msra.mxu0 %v396_v33  ;;  %v661_v33 = vld [vmem:[%s2645_s11] sm:$0xff] }
  0xb0   :  { %1436 = vmatpush3.msra.mxu1 %v295_v24  ;;  %1458 = vmatprep.subr.mxu0 %v1953_v0  ;;  %v665_v24 = vld [vmem:[%s2645_s11 + $0x20] sm:$0xff] }
  0xb1   :  { %1437 = vmatprep.subr.mxu1 %v1953_v0  ;;  %1459 = vmatpush3.msra.mxu0 %v395_v34  ;;  %v759_v34 = vld [vmem:[#allocation12 + $0x8] sm:$0xff] }
  0xb2   :  { %1438 = vmatpush3.msra.mxu1 %v294_v25  ;;  %1460 = vmatprep.subr.mxu0 %v1953_v0  ;;  %v664_v25 = vld [vmem:[%s2645_s11 + $0x18] sm:$0xff] }
  0xb3   :  { %1477 = vmatprep.subr.mxu1 %v1953_v0  ;;  %1461 = vmatpush3.msra.mxu0 %v394_v35  ;;  %v1257_v35 = vld [vmem:[%s2644_s10] ss:$0 sm:$0xff] }
  0xb4   :  { %1462 = vmatprep.subr.mxu0 %v1953_v0 }
  0xb5   :  { %1463 = vmatpush3.msra.mxu0 %v393_v36 }
  0xb6   :  { %1464 = vmatprep.subr.mxu0 %v1953_v0 }
  0xb7   :  { %1465 = vmatpush3.msra.mxu0 %v392_v37 }
  0xb8   :  { %1466 = vmatprep.subr.mxu0 %v1953_v0 }
  0xb9   :  { %1467 = vmatpush3.msra.mxu0 %v391_v38 }
  0xba   :  { %1468 = vmatprep.subr.mxu0 %v1953_v0 }
  0xbb   :  { %1469 = vmatpush3.msra.mxu0 %v390_v44  ;;  %v1105_v44 = vld [vmem:[%s2654_s20 + $0x18] sm:$0xff] }
  0xbc   :  { %1470 = vmatprep.subr.mxu0 %v1953_v0 }
  0xbd   :  { %1471 = vmatpush3.msra.mxu0 %v389_v45 }
  0xbe   :  { %1472 = vmatprep.subr.mxu0 %v1953_v0 }
  0xbf   :  { %1473 = vmatpush3.msra.mxu0 %v388_v46 }
  0xc0   :  { %1523 = vmatprep.subr.mxu0 %v1953_v0 }
 0x15e   :  { %v289_v40 = vpop.f32.mrf.mxu0 }
 0x15f   :  { %v290_v41 = vadd.f32 %v1251_v39, %v289_v40  ;;  %v758_v40 = vld [vmem:[#allocation12] sm:$0xff] }
 0x160   :  { %v1406_v42 = vpop.f32.mrf.mxu0 }
 0x161   :  { %v293_v43 = vmax.f32 %v290_v41, 0.0  ;;  %v1102_v41 = vld [vmem:[%s2654_s20] sm:$0xff]  ;;  %v1103_v42 = vld [vmem:[%s2654_s20 + $0x8] sm:$0xff] }
 0x162   :  { %v1122_v45 = vmul.f32 %v1102_v41, %v1102_v41  ;;  %v1123_v46 = vmul.f32 %v1103_v42, %v1103_v42  ;;  %v755_v41 = vld [vmem:[#allocation11 + $0x8] sm:$0xff]  ;;  %v754_v42 = vld [vmem:[#allocation11] sm:$0xff] }
 0x163   :  { %1440 = vmatmul.mubr.f32.vlgmr.msra.gmra.mxu1 %v293_v43  ;;  %v1104_v43 = vld [vmem:[%s2654_s20 + $0x10] sm:$0xff] }
 0x164   :  { %1485 = vmatprep.mubr.msk.f32.mxu1 %vm1954_vm0, %v1953_v0  ;;  %1478 = vmatpush3.msra.mxu1 %v484_v47  ;;  %v1124_v47 = vmul.f32 %v1104_v43, %v1104_v43  ;;  %v919_v43 = vld [vmem:[%s2650_s16 + $0x30] sm:$0xff] }
 0x165   :  { %1479 = vmatprep.subr.mxu1 %v1953_v0 }
 0x166   :  { %1480 = vmatpush3.msra.mxu1 %v483_v48  ;;  %v1106_v48 = vld [vmem:[%s2654_s20 + $0x20] sm:$0xff] }
 0x167   :  { %1481 = vmatprep.subr.mxu1 %v1953_v0 }
 0x168   :  { %1482 = vmatpush3.msra.mxu1 %v482_v54  ;;  %v928_v54 = vld [vmem:[%s2650_s16 + $0x78] sm:$0xff] }
 0x169   :  { %1483 = vmatprep.subr.mxu1 %v1953_v0 }
 0x16a   :  { %1484 = vmatpush3.msra.mxu1 %v481_v55  ;;  %v927_v55 = vld [vmem:[%s2650_s16 + $0x70] sm:$0xff] }
 0x16b   :  { %1488 = vmatprep.subr.mxu1 %v1953_v0 }
 0x223   :  { %v383_v50 = vpop.f32.mrf.mxu1 }
 0x224   :  { %v384_v51 = vadd.f32 %v1253_v49, %v383_v50  ;;  %v1125_v49 = vmul.f32 %v1105_v44, %v1105_v44  ;;  %v1138_v50 = vadd.f32 %v1123_v46, %v1122_v45  ;;  %v918_v44 = vld [vmem:[%s2650_s16 + $0x28] sm:$0xff]  ;;  %v916_v45 = vld [vmem:[%s2650_s16 + $0x18] sm:$0xff]  ;;  %v915_v46 = vld [vmem:[%s2650_s16 + $0x10] sm:$0xff] }
 0x225   :  { %v1441_v52 = vpop.f32.mrf.mxu1 }
 0x226   :  { %v387_v53 = vmax.f32 %v384_v51, 0.0  ;;  %v1107_v51 = vld [vmem:[%s2654_s20 + $0x28] sm:$0xff]  ;;  %v1126_v52 = vmul.f32 %v1106_v48, %v1106_v48  ;;  %v913_v48 = vld [vmem:[%s2650_s16] sm:$0xff] }
 0x228   :  { %1475 = vmatmul.mubr.f32.vlgmr.msra.gmra.mxu0 %v387_v53  ;;  %v1139_v53 = vadd.f32 %v1138_v50, %v1124_v47  ;;  %v914_v47 = vld [vmem:[%s2650_s16 + $0x8] sm:$0xff] }
 0x229   :  { %1555 = vmatprep.mubr.msk.f32.mxu0 %vm1954_vm0, %v1953_v0  ;;  %1524 = vmatpush3.msra.mxu0 %v676_v13  ;;  %v922_v13 = vld [vmem:[%s2650_s16 + $0x48] sm:$0xff] }
 0x22a   :  { %1525 = vmatprep.subr.mxu0 %v1953_v0  ;;  %v1119_v50 = vld [vmem:[#allocation18 + $0x8] sm:$0xff] }
 0x22b   :  { %1526 = vmatpush3.msra.mxu0 %v675_v14  ;;  %v1113_v14 = vld [vmem:[%s2654_s20 + $0x58] sm:$0xff] }
 0x22c   :  { %1527 = vmatprep.subr.mxu0 %v1953_v0 }
 0x22d   :  { %1528 = vmatpush3.msra.mxu0 %v674_v15 }
 0x22e   :  { %1529 = vmatprep.subr.mxu0 %v1953_v0 }
 0x22f   :  { %1530 = vmatpush3.msra.mxu0 %v673_v16 }
 0x230   :  { %1531 = vmatprep.subr.mxu0 %v1953_v0 }
 0x231   :  { %1532 = vmatpush3.msra.mxu0 %v672_v17  ;;  %v921_v17 = vld [vmem:[%s2650_s16 + $0x40] sm:$0xff] }
 0x232   :  { %1533 = vmatprep.subr.mxu0 %v1953_v0 }
 0x233   :  { %1534 = vmatpush3.msra.mxu0 %v671_v18  ;;  %v1114_v18 = vld [vmem:[%s2654_s20 + $0x60] sm:$0xff] }
 0x234   :  { %1535 = vmatprep.subr.mxu0 %v1953_v0 }
 0x235   :  { %1536 = vmatpush3.msra.mxu0 %v670_v19  ;;  %v1133_v19 = vmul.f32 %v1113_v14, %v1113_v14  ;;  %v1017_v14 = vld [vmem:[%s2652_s18 + $0x50] sm:$0xff] }
 0x236   :  { %1537 = vmatprep.subr.mxu0 %v1953_v0 }
 0x237   :  { %1538 = vmatpush3.msra.mxu0 %v669_v20 }
 0x238   :  { %1539 = vmatprep.subr.mxu0 %v1953_v0 }
 0x239   :  { %1540 = vmatpush3.msra.mxu0 %v668_v21  ;;  %v920_v21 = vld [vmem:[%s2650_s16 + $0x38] sm:$0xff] }
 0x23a   :  { %1541 = vmatprep.subr.mxu0 %v1953_v0 }
 0x23b   :  { %1542 = vmatpush3.msra.mxu0 %v667_v22  ;;  %v1115_v22 = vld [vmem:[%s2654_s20 + $0x68] sm:$0xff] }
 0x23c   :  { %1543 = vmatprep.subr.mxu0 %v1953_v0 }
 0x23d   :  { %1544 = vmatpush3.msra.mxu0 %v666_v23  ;;  %v1134_v23 = vmul.f32 %v1114_v18, %v1114_v18  ;;  %v1013_v18 = vld [vmem:[%s2652_s18 + $0x30] sm:$0xff] }
 0x23e   :  { %1545 = vmatprep.subr.mxu0 %v1953_v0 }
 0x23f   :  { %1546 = vmatpush3.msra.mxu0 %v665_v24 }
 0x240   :  { %1547 = vmatprep.subr.mxu0 %v1953_v0 }
 0x241   :  { %1548 = vmatpush3.msra.mxu0 %v664_v25  ;;  %v1116_v25 = vld [vmem:[%s2654_s20 + $0x70] sm:$0xff] }
 0x242   :  { %1549 = vmatprep.subr.mxu0 %v1953_v0 }
 0x243   :  { %1550 = vmatpush3.msra.mxu0 %v663_v31 }
 0x244   :  { %1551 = vmatprep.subr.mxu0 %v1953_v0 }
 0x245   :  { %1552 = vmatpush3.msra.mxu0 %v662_v32 }
 0x246   :  { %1553 = vmatprep.subr.mxu0 %v1953_v0 }
 0x247   :  { %1554 = vmatpush3.msra.mxu0 %v661_v33 }
 0x248   :  { %1576 = vmatprep.subr.mxu0 %v1953_v0 }
 0x2e8   :  { %v477_v57 = vpop.f32.mrf.mxu0 }
 0x2e9   :  { %v2287_v58 = vadd.f32 %v1254_v56, %v477_v57  ;;  %v1108_v56 = vld [vmem:[%s2654_s20 + $0x30] sm:$0xff]  ;;  %v1127_v57 = vmul.f32 %v1107_v51, %v1107_v51 }
 0x2ea   :  { %v1476_v60 = vpop.f32.mrf.mxu0  ;;  %v1120_v51 = vld [vmem:[#allocation18 + $0x10] sm:$0xff] }
 0x2eb   :  { %1486 = vmatmul.mubr.msk.f32.vlgmr.msra.gmra.mxu1 %vm492_vm2, %v2287_v58  ;;  %v926_v60 = vld [vmem:[%s2650_s16 + $0x68] sm:$0xff] }
 0x2ec   :  { %1489 = vmatpush3.msra.mxu1 %v582_v59  ;;  %1520 = vmatprep.mubr.msk.f32.mxu1 %vm1954_vm0, %v1953_v0  ;;  %v1140_v59 = vadd.f32 %v1139_v53, %v1125_v49  ;;  %v1118_v49 = vld [vmem:[#allocation18] sm:$0xff]  ;;  %v1121_v53 = vld [vmem:[#allocation18 + $0x18] sm:$0xff] }
 0x2ed   :  { %1490 = vmatprep.subr.mxu1 %v1953_v0 }
 0x2ee   :  { %1491 = vmatpush3.msra.mxu1 %v581_v61  ;;  %v1109_v61 = vld [vmem:[%s2654_s20 + $0x38] sm:$0xff] }
 0x2ef   :  { %1492 = vmatprep.subr.mxu1 %v1953_v0 }
 0x2f0   :  { %1493 = vmatpush3.msra.mxu1 %v580_v62  ;;  %v1128_v62 = vmul.f32 %v1108_v56, %v1108_v56  ;;  %v1173_v56 = vmul.f32 %v1120_v51, %v1120_v51 }
 0x2f1   :  { %1494 = vmatprep.subr.mxu1 %v1953_v0 }
 0x2f2   :  { %1495 = vmatpush3.msra.mxu1 %v579_v63  ;;  %v1141_v63 = vadd.f32 %v1140_v59, %v1126_v52  ;;  %v1174_v59 = vmul.f32 %v1121_v53, %v1121_v53 }
 0x2f3   :  { %1496 = vmatprep.subr.mxu1 %v1953_v0 }
 0x2f4   :  { %1497 = vmatpush3.msra.mxu1 %v578_v1  ;;  %v925_v1 = vld [vmem:[%s2650_s16 + $0x60] sm:$0xff] }
 0x2f5   :  { %1498 = vmatprep.subr.mxu1 %v1953_v0 }
 0x2f6   :  { %1499 = vmatpush3.msra.mxu1 %v577_v2  ;;  %v1110_v2 = vld [vmem:[%s2654_s20 + $0x40] sm:$0xff] }
 0x2f7   :  { %1500 = vmatprep.subr.mxu1 %v1953_v0 }
 0x2f8   :  { %1501 = vmatpush3.msra.mxu1 %v576_v3  ;;  %v1129_v3 = vmul.f32 %v1109_v61, %v1109_v61 }
 0x2f9   :  { %1502 = vmatprep.subr.mxu1 %v1953_v0 }
 0x2fa   :  { %1503 = vmatpush3.msra.mxu1 %v575_v4  ;;  %v1142_v4 = vadd.f32 %v1141_v63, %v1127_v57 }
 0x2fb   :  { %1504 = vmatprep.subr.mxu1 %v1953_v0 }
 0x2fc   :  { %1505 = vmatpush3.msra.mxu1 %v574_v5  ;;  %v924_v5 = vld [vmem:[%s2650_s16 + $0x58] sm:$0xff] }
 0x2fd   :  { %1506 = vmatprep.subr.mxu1 %v1953_v0 }
 0x2fe   :  { %1507 = vmatpush3.msra.mxu1 %v573_v6  ;;  %v1111_v6 = vld [vmem:[%s2654_s20 + $0x48] sm:$0xff] }
 0x2ff   :  { %1508 = vmatprep.subr.mxu1 %v1953_v0 }
 0x300   :  { %1509 = vmatpush3.msra.mxu1 %v572_v7  ;;  %v1130_v7 = vmul.f32 %v1110_v2, %v1110_v2  ;;  %v1180_v2 = vsel %vm492_vm2, %v1174_v59, 0.0 }
 0x301   :  { %1510 = vmatprep.subr.mxu1 %v1953_v0 }
 0x302   :  { %1511 = vmatpush3.msra.mxu1 %v571_v8  ;;  %v1143_v8 = vadd.f32 %v1142_v4, %v1128_v62  ;;  %v1178_v62 = vsel %vm492_vm2, %v1173_v56, 0.0 }
 0x303   :  { %1512 = vmatprep.subr.mxu1 %v1953_v0 }
 0x304   :  { %1513 = vmatpush3.msra.mxu1 %v570_v9  ;;  %v923_v9 = vld [vmem:[%s2650_s16 + $0x50] sm:$0xff] }
 0x305   :  { %1514 = vmatprep.subr.mxu1 %v1953_v0 }
 0x306   :  { %1515 = vmatpush3.msra.mxu1 %v569_v10  ;;  %v1112_v10 = vld [vmem:[%s2654_s20 + $0x50] sm:$0xff] }
 0x307   :  { %1516 = vmatprep.subr.mxu1 %v1953_v0  ;;  %v1132_v15 = vmul.f32 %v1112_v10, %v1112_v10  ;;  %v1021_v10 = vld [vmem:[%s2652_s18 + $0x70] sm:$0xff] }
 0x308   :  { %1517 = vmatpush3.msra.mxu1 %v568_v11  ;;  %v1131_v11 = vmul.f32 %v1111_v6, %v1111_v6 }
 0x309   :  { %1518 = vmatprep.subr.mxu1 %v1953_v0 }
 0x30a   :  { %1519 = vmatpush3.msra.mxu1 %v567_v12  ;;  %v1144_v12 = vadd.f32 %v1143_v8, %v1129_v3 }
 0x30b   :  { %1558 = vmatprep.subr.mxu1 %v1953_v0 }
 0x30c   :  { %v1145_v16 = vadd.f32 %v1144_v12, %v1130_v7  ;;  %v1019_v12 = vld [vmem:[%s2652_s18 + $0x60] sm:$0xff] }
 0x30e   :  { %v1146_v20 = vadd.f32 %v1145_v16, %v1131_v11  ;;  %v1020_v11 = vld [vmem:[%s2652_s18 + $0x68] sm:$0xff]  ;;  %v1015_v16 = vld [vmem:[%s2652_s18 + $0x40] sm:$0xff] }
 0x310   :  { %v1147_v24 = vadd.f32 %v1146_v20, %v1132_v15  ;;  %v1016_v15 = vld [vmem:[%s2652_s18 + $0x48] sm:$0xff]  ;;  %v1011_v20 = vld [vmem:[%s2652_s18 + $0x20] sm:$0xff] }
 0x3ab   :  { %v562_v27 = vpop.f32.mrf.mxu1 }
 0x3ac   :  { %v563_v28 = vadd.f32 %v1255_v26, %v562_v27  ;;  %v1135_v26 = vmul.f32 %v1115_v22, %v1115_v22  ;;  %v1148_v27 = vadd.f32 %v1147_v24, %v1133_v19  ;;  %v1012_v19 = vld [vmem:[%s2652_s18 + $0x28] sm:$0xff] }
 0x3ad   :  { %v1487_v29 = vpop.f32.mrf.mxu1 }
 0x3ae   :  { %v566_v30 = vmax.f32 %v563_v28, 0.0  ;;  %v1117_v28 = vld [vmem:[%s2654_s20 + $0x78] sm:$0xff]  ;;  %v1136_v29 = vmul.f32 %v1116_v25, %v1116_v25 }
 0x3af   :  { %v1137_v31 = vmul.f32 %v1117_v28, %v1117_v28 }
 0x3b0   :  { %1521 = vmatmul.mubr.f32.vlgmr.msra.gmra.mxu1 %v566_v30  ;;  %v1149_v30 = vadd.f32 %v1148_v27, %v1134_v23 }
 0x3b1   :  { %1562 = vmatprep.mubr.msk.f32.mxu1 %vm1954_vm0, %v1953_v0  ;;  %1559 = vmatpush3.msra.mxu1 %v759_v34 }
 0x3b2   :  { %1560 = vmatprep.subr.mxu1 %v1953_v0  ;;  %v1150_v32 = vadd.f32 %v1149_v30, %v1135_v26 }
 0x3b3   :  { %1561 = vmatpush3.msra.mxu1 %v758_v40  ;;  %v756_v40 = vld [vmem:[#allocation11 + $0x10] sm:$0xff] }
 0x3b4   :  { %1565 = vmatprep.subr.mxu1 %v1953_v0  ;;  %v1151_v33 = vadd.f32 %v1150_v32, %v1136_v29 }
 0x3b6   :  { %v1152_v34 = vadd.f32 %v1151_v33, %v1137_v31  ;;  %v1261_v31 = vld [vmem:[#allocation14] ss:$0 sm:$0xff] }
 0x3b8   :  { %1153 = vadd.xlane.f32.xlu0 %v1152_v34 }
 0x441   :  { %v1154_v52 = vpop.xlane.xlu0 %1153 }
 0x442   :  { %v1155_v57 = vrot.slane %v1154_v52, 4 }
 0x444   :  { %v1156_v63 = vadd.f32 %v1155_v57, %v1154_v52 }
 0x446   :  { %v1157_v3 = vrot.slane %v1156_v63, 2 }
 0x470   :  { %v656_v36 = vpop.f32.mrf.mxu1 }
 0x471   :  { %v657_v37 = vadd.f32 %v1257_v35, %v656_v36  ;;  %v1258_v35 = vld [vmem:[%s2646_s12] ss:$0 sm:$0xff] }
 0x472   :  { %v1522_v38 = vpop.f32.mrf.mxu1 }
 0x473   :  { %v660_v39 = vmax.f32 %v657_v37, 0.0  ;;  %v757_v38 = vld [vmem:[#allocation11 + $0x18] sm:$0xff] }
 0x475   :  { %1556 = vmatmul.mubr.f32.vlgmr.msra.gmra.mxu0 %v660_v39 }
 0x476   :  { %1608 = vmatprep.mubr.msk.f32.mxu0 %vm1954_vm0, %v1953_v0  ;;  %1577 = vmatpush3.msra.mxu0 %v928_v54  ;;  %v1171_v54 = vmul.f32 %v1118_v49, %v1118_v49 }
 0x477   :  { %1578 = vmatprep.subr.mxu0 %v1953_v0 }
 0x478   :  { %1579 = vmatpush3.msra.mxu0 %v927_v55  ;;  %v1172_v55 = vmul.f32 %v1119_v50, %v1119_v50 }
 0x479   :  { %1580 = vmatprep.subr.mxu0 %v1953_v0 }
 0x47a   :  { %1581 = vmatpush3.msra.mxu0 %v926_v60  ;;  %v1175_v60 = vsel %vm492_vm2, %v1171_v54, 0.0  ;;  %v1176_v61 = vsel %vm492_vm2, %v1172_v55, 0.0 }
 0x47b   :  { %1582 = vmatprep.subr.mxu0 %v1953_v0 }
 0x47c   :  { %1583 = vmatpush3.msra.mxu0 %v925_v1  ;;  %v1177_v1 = vadd.f32 %v1176_v61, %v1175_v60 }
 0x47d   :  { %1584 = vmatprep.subr.mxu0 %v1953_v0 }
 0x47e   :  { %1585 = vmatpush3.msra.mxu0 %v924_v5  ;;  %v1179_v4 = vadd.f32 %v1178_v62, %v1177_v1  ;;  %v1158_v5 = vadd.f32 %v1157_v3, %v1156_v63 }
 0x47f   :  { %1586 = vmatprep.subr.mxu0 %v1953_v0 }
 0x480   :  { %1587 = vmatpush3.msra.mxu0 %v923_v9  ;;  %v1181_v6 = vadd.f32 %v1180_v2, %v1179_v4  ;;  %v1159_v7 = vrot.slane %v1158_v5, 1  ;;  %v1022_v9 = vld [vmem:[%s2652_s18 + $0x78] sm:$0xff] }
 0x481   :  { %1588 = vmatprep.subr.mxu0 %v1953_v0 }
 0x482   :  { %1589 = vmatpush3.msra.mxu0 %v922_v13  ;;  %1182 = vadd.xlane.f32.xlu0 %v1181_v6  ;;  %v1160_v8 = vadd.f32 %v1159_v7, %v1158_v5  ;;  %v1018_v13 = vld [vmem:[%s2652_s18 + $0x58] sm:$0xff] }
 0x483   :  { %1590 = vmatprep.subr.mxu0 %v1953_v0 }
 0x484   :  { %1591 = vmatpush3.msra.mxu0 %v921_v17  ;;  %1646 = vpush %v1160_v8  ;;  %v1014_v17 = vld [vmem:[%s2652_s18 + $0x38] sm:$0xff] }
 0x485   :  { %1592 = vmatprep.subr.mxu0 %v1953_v0 }
 0x486   :  { %1593 = vmatpush3.msra.mxu0 %v920_v21  ;;  %v1010_v21 = vld [vmem:[%s2652_s18 + $0x18] sm:$0xff] }
 0x487   :  { %1594 = vmatprep.subr.mxu0 %v1953_v0 }
 0x488   :  { %1595 = vmatpush3.msra.mxu0 %v919_v43  ;;  %v1009_v43 = vld [vmem:[%s2652_s18 + $0x10] sm:$0xff] }
 0x489   :  { %1596 = vmatprep.subr.mxu0 %v1953_v0 }
 0x48a   :  { %1597 = vmatpush3.msra.mxu0 %v918_v44  ;;  %v1008_v44 = vld [vmem:[%s2652_s18 + $0x8] sm:$0xff] }
 0x48b   :  { %1598 = vmatprep.subr.mxu0 %v1953_v0 }
 0x4b5   :  { %s1647_s9 = spop %1646 }
 0x4b6   :  { %v1162_v22 = vstv %s1647_s9 }
 0x4b7   :  { %1671 = vrsqrt.f32 %v1162_v22  ;;  %vm1165_vm4 = vcmp.eq.f32.partialorder %v1162_v22, inf  ;;  %v1168_v24 = vand.u32 2147483648, %v1162_v22  ;;  %vm1167_vm5 = vcmp.eq.f32.partialorder %v1162_v22, 0.0 }
 0x4c4   :  { %v1672_v23 = vpop.eup %1671 }
 0x4c5   :  { %v1164_v25 = vmul.f32 %v1672_v23, %v1162_v22 }
 0x4c7   :  { %v1166_v26 = vsel %vm1165_vm4, %v1162_v22, %v1164_v25 }
 0x4c8   :  { %v1169_v27 = vsel %vm1167_vm5, %v1168_v24, %v1166_v26 }
 0x4c9   :  { %1648 = vpush %v1169_v27 }
 0x4fa   :  { %s1649_s0 = spop %1648 }
 0x535   :  { %v750_v36 = vpop.f32.mrf.mxu0 }
 0x536   :  { %v751_v37 = vadd.f32 %v1258_v35, %v750_v36  ;;  %v1183_v36 = vpop.xlane.xlu0 %1182 }
 0x537   :  { %v1557_v39 = vpop.f32.mrf.mxu0 }
 0x538   :  { %1563 = vmatmul.mubr.msk.f32.vlgmr.msra.gmra.mxu1 %vm760_vm3, %v751_v37  ;;  %1101 = vst.msk [vmem:[#allocation21] sm:$0xff] %vm760_vm3, %v751_v37  ;;  %v1184_v37 = vrot.slane %v1183_v36, 4 }
 0x539   :  { %1566 = vmatpush3.msra.mxu1 %v757_v38  ;;  %1573 = vmatprep.mubr.msk.f32.mxu1 %vm1954_vm0, %v1953_v0 }
 0x53a   :  { %1567 = vmatprep.subr.mxu1 %v1953_v0  ;;  %v1185_v38 = vadd.f32 %v1184_v37, %v1183_v36 }
 0x53b   :  { %1568 = vmatpush3.msra.mxu1 %v756_v40 }
 0x53c   :  { %1569 = vmatprep.subr.mxu1 %v1953_v0  ;;  %v1186_v39 = vrot.slane %v1185_v38, 2 }
 0x53d   :  { %1570 = vmatpush3.msra.mxu1 %v755_v41 }
 0x53e   :  { %1571 = vmatprep.subr.mxu1 %v1953_v0  ;;  %v1187_v40 = vadd.f32 %v1186_v39, %v1185_v38 }
 0x53f   :  { %1572 = vmatpush3.msra.mxu1 %v754_v42 }
 0x540   :  { %1574 = vmatmul.mubr.msk.f32.vlgmr.msra.gmra.mxu1 %vm492_vm2, %v2287_v58  ;;  %1611 = vmatprep.subr.mxu1 %v1953_v0  ;;  %v917_v58 = vld [vmem:[%s2650_s16 + $0x20] sm:$0xff]  ;;  %v1188_v41 = vrot.slane %v1187_v40, 1 }
 0x541   :  { %1643 = vmatprep.mubr.msk.f32.mxu1 %vm1954_vm0, %v1953_v0  ;;  %1599 = vmatpush3.msra.mxu0 %v917_v58  ;;  %v1007_v58 = vld [vmem:[%s2652_s18] sm:$0xff]  ;;  %s1955_s18 = smov [#allocation21]  }
 0x542   :  { %1600 = vmatprep.subr.mxu0 %v1953_v0  ;;  %1612 = vmatpush3.msra.mxu1 %v1022_v9  ;;  %v1189_v42 = vadd.f32 %v1188_v41, %v1187_v40  ;;  %s1220_s25 = sshll.u32 %s1955_s18, 4  ;;  %s1221_s25 = int_to_ptr.vmem [resolvable:$true] %s1220_s25 }
 0x543   :  { %1601 = vmatpush3.msra.mxu0 %v916_v45  ;;  %1613 = vmatprep.subr.mxu1 %v1953_v0  ;;  %s1875_s1 = scalar_lea.vmem %s1221_s25, 128  ;;  %p1880_p9 = scmp.lt.s32.totalorder %s1221_s25, %s1221_s25 }
 0x544   :  { %1602 = vmatprep.subr.mxu0 %v1953_v0  ;;  %1614 = vmatpush3.msra.mxu1 %v1021_v10  ;;  %1650 = vpush %v1189_v42  ;;  %p1876_p8 = scmp.ne.s32.totalorder %s1221_s25, %s1875_s1  ;;  %p1881_p10 = scmp.lt.s32.totalorder %s1875_s1, %s1875_s1 }
 0x545   :  { %1603 = vmatpush3.msra.mxu0 %v915_v46  ;;  %1615 = vmatprep.subr.mxu1 %v1953_v0 }
 0x546   :  { %1604 = vmatprep.subr.mxu0 %v1953_v0  ;;  %1616 = vmatpush3.msra.mxu1 %v1020_v11  ;;  %p1882_p11 = por %p1881_p10, %p1880_p9 }
 0x547   :  { %1605 = vmatpush3.msra.mxu0 %v914_v47  ;;  %1617 = vmatprep.subr.mxu1 %v1953_v0 }
 0x548   :  { %1606 = vmatprep.subr.mxu0 %v1953_v0  ;;  %1618 = vmatpush3.msra.mxu1 %v1019_v12  ;;  %p1883_p12 = pnand %p1882_p11, %p1876_p8 }
 0x549   :  { %1607 = vmatpush3.msra.mxu0 %v913_v48  ;;  %1619 = vmatprep.subr.mxu1 %v1953_v0 }
 0x54a   :  { %1620 = vmatpush3.msra.mxu1 %v1018_v13 }
 0x54b   :  { %1621 = vmatprep.subr.mxu1 %v1953_v0 }
 0x54c   :  { %1622 = vmatpush3.msra.mxu1 %v1017_v14 }
 0x54d   :  { %1623 = vmatprep.subr.mxu1 %v1953_v0 }
 0x54e   :  { %1624 = vmatpush3.msra.mxu1 %v1016_v15 }
 0x54f   :  { %1625 = vmatprep.subr.mxu1 %v1953_v0 }
 0x550   :  { %1626 = vmatpush3.msra.mxu1 %v1015_v16 }
 0x551   :  { %1627 = vmatprep.subr.mxu1 %v1953_v0 }
 0x552   :  { %1628 = vmatpush3.msra.mxu1 %v1014_v17 }
 0x553   :  { %1629 = vmatprep.subr.mxu1 %v1953_v0 }
 0x554   :  { %1630 = vmatpush3.msra.mxu1 %v1013_v18 }
 0x555   :  { %1631 = vmatprep.subr.mxu1 %v1953_v0 }
 0x556   :  { %1632 = vmatpush3.msra.mxu1 %v1012_v19 }
 0x557   :  { %1633 = vmatprep.subr.mxu1 %v1953_v0 }
 0x558   :  { %1634 = vmatpush3.msra.mxu1 %v1011_v20 }
 0x559   :  { %1635 = vmatprep.subr.mxu1 %v1953_v0 }
 0x55a   :  { %1636 = vmatpush3.msra.mxu1 %v1010_v21 }
 0x55b   :  { %1637 = vmatprep.subr.mxu1 %v1953_v0 }
 0x55c   :  { %1638 = vmatpush3.msra.mxu1 %v1009_v43 }
 0x55d   :  { %1639 = vmatprep.subr.mxu1 %v1953_v0 }
 0x55e   :  { %1640 = vmatpush3.msra.mxu1 %v1008_v44 }
 0x55f   :  { %1641 = vmatprep.subr.mxu1 %v1953_v0  ;;  %v1262_v0 = vld [vmem:[#allocation15] ss:$0 sm:$0xff] }
 0x560   :  { %1642 = vmatpush3.msra.mxu1 %v1007_v58 }
 0x575   :  { %s1651_s30 = spop %1650 }
 0x576   :  { %v1191_v45 = vstv %s1651_s30 }
 0x577   :  { %1673 = vrsqrt.f32 %v1191_v45  ;;  %vm1194_vm6 = vcmp.eq.f32.partialorder %v1191_v45, inf  ;;  %v1197_v47 = vand.u32 2147483648, %v1191_v45  ;;  %vm1196_vm7 = vcmp.eq.f32.partialorder %v1191_v45, 0.0 }
 0x584   :  { %v1674_v46 = vpop.eup %1673 }
 0x585   :  { %v1193_v48 = vmul.f32 %v1674_v46, %v1191_v45 }
 0x587   :  { %v1195_v49 = vsel %vm1194_vm6, %v1191_v45, %v1193_v48 }
 0x588   :  { %v1198_v50 = vsel %vm1196_vm7, %v1197_v47, %v1195_v49 }
 0x589   :  { %1652 = vpush %v1198_v50 }
 0x5ba   :  { %s1653_s13 = spop %1652 }
 0x5bb   :  { %s1200_s11 = sadd.f32 %s1653_s13, %s1649_s0 }
 0x5bd   :  { %s1201_s17 = smul.f32 0.001, %s1200_s11 }
 0x5bf   :  { %1203 = sst [smem:[#allocation23]] %s1201_s17 }
 0x5f8   :  { %v830_v28 = vpop.f32.mrf.mxu1 }
 0x5fa   :  { %v1564_v29 = vpop.f32.mrf.mxu1 }
 0x600   :  { %v900_v30 = vpop.f32.mrf.mxu1 }
 0x601   :  { %v901_v32 = vadd.f32 %v900_v30, %v830_v28 }
 0x602   :  { %v1575_v33 = vpop.f32.mrf.mxu1 }
 0x603   :  { %v911_v34 = vadd.f32 %v1261_v31, %v901_v32 }
 0x605   :  { %v912_v35 = vmax.f32 %v911_v34, 0.0 }
 0x607   :  { %1609 = vmatmul.mubr.f32.vlgmr.msra.gmra.mxu0 %v912_v35 }
 0x6c7   :  { %v1002_v51 = vpop.f32.mrf.mxu0 }
 0x6c8   :  { %v1003_v52 = vadd.f32 %v1262_v0, %v1002_v51 }
 0x6c9   :  { %v1610_v53 = vpop.f32.mrf.mxu0 }
 0x6ca   :  { %v1006_v54 = vmax.f32 %v1003_v52, 0.0 }
 0x6cc   :  { %1644 = vmatmul.mubr.f32.vlgmr.msra.gmra.mxu1 %v1006_v54 }
 0x6cd   :  { %1886 = shalt.err (!%p1883_p12)
}
 0x6ce   :  { %1223 = dma.vmem_to_hbm [thread:$0]  %s1221_s25, 128, %s2657_s23, [#allocation22]   ;;  %v1263_v55 = vld [vmem:[#allocation17] ss:$0 sm:$0xff] }
 0x6cf   :  { %s1956_s10 = smov [#allocation23]   ;;  %s1957_s26 = smov [#allocation20]  }
 0x6d0   :  { %1231 = dma.smem_to_hbm %s1956_s10, 16, %s2658_s24, [#allocation5]  }
 0x6d1   :  { %s1210_s19 = sshll.u32 %s1957_s26, 4  ;;  %s1211_s19 = int_to_ptr.vmem [resolvable:$true] %s1210_s19 }
 0x6d2   :  { %s1903_s21 = scalar_lea.vmem %s1211_s19, 128  ;;  %p1908_p0 = scmp.lt.s32.totalorder %s1211_s19, %s1211_s19 }
 0x6d3   :  { %p1904_p13 = scmp.ne.s32.totalorder %s1211_s19, %s1903_s21  ;;  %p1909_p1 = scmp.lt.s32.totalorder %s1903_s21, %s1903_s21 }
 0x6d5   :  { %p1910_p2 = por %p1909_p1, %p1908_p0 }
 0x6d7   :  { %p1911_p3 = pnand %p1910_p2, %p1904_p13 }
 0x78c   :  { %v1096_v56 = vpop.f32.mrf.mxu1 }
 0x78d   :  { %v1097_v57 = vadd.f32 %v1263_v55, %v1096_v56 }
 0x78e   :  { %v1645_v59 = vpop.f32.mrf.mxu1 }
 0x78f   :  { %1100 = vst.msk [vmem:[#allocation20] sm:$0xff] %vm219_vm1, %v1097_v57 }
 0x790   :  { %1914 = shalt.err (!%p1911_p3)
}
 0x791   :  { %1213 = dma.vmem_to_hbm [thread:$0]  %s1211_s19, 128, %s2656_s22, [#allocation4]  }
 0x792   :  { %1935 = dma.done.wait [#allocation4], 128  }
 0x793   :  { %1936 = vsyncadd [#allocation4], 4294967168 }
 0x794   :  { %1937 = dma.done.wait [#allocation22], 128  }
 0x795   :  { %1938 = vsyncadd [#allocation22], 4294967168 }
 0x796   :  { %1939 = dma.done.wait [#allocation5], 16  }
 0x797   :  { %1940 = vsyncadd [#allocation5], 4294967280 }
 0x798   :  { %1241 = sfence }
 0x799   :  { %1242 = vsyncpa [#allocation3], 1 }
 0x79a   :  { %1243 = vsyncpa [#allocation7], 1 }
 0x79b   :  { %1244 = vsyncpa [#allocation10], 1 }
 0x79c   :  { %1245 = vsyncpa [#allocation13], 1 }
 0x79d   :  { %1246 = vsyncpa [#allocation16], 1 }
 0x79e   :  { %1247 = vsyncpa [#allocation19], 1 }
 0x79f   :  { %1248 = vsyncpa [#allocation4], 1 }
 0x7a0   :  { %1249 = vsyncpa [#allocation22], 1 }
 0x7a1   :  { %1250 = vsyncpa [#allocation5], 1 }

</bundles_post_ra>
